<compile_context>
chip_gen: v7x
topology: tpu7x:2x2x1
jax: 0.10.0
libtpu: 0.0.40
codegen_flags: <defaults>
</compile_context>

<pallas_src>
import functools

import jax
import jax.numpy as jnp
from jax import lax
from jax.experimental import pallas as pl
from jax.experimental.pallas import tpu as pltpu

_LANES = 128
_SUBLANES = 8


def _l1_sum_kernel(b_ref, f_ref, out_ref, *, block_rows, blocks_per_slice,
                   num_blocks, valid_rows, needs_mask):
    """One slice of the sum(|f - b|) reduction.

    Grid = (slice, block-within-slice).  The (8, 128) output block is resident
    across the reduction axis and used directly as the accumulator.
    """
    i = pl.program_id(1)

    @pl.when(i == 0)
    def _():
        out_ref[...] = jnp.zeros_like(out_ref)

    abs_diff = jnp.abs(f_ref[...].astype(jnp.float32)
                       - b_ref[...].astype(jnp.float32))

    def fold(x):
        # (block_rows, 128) -> (block_rows/8, 8, 128) keeps every (8, 128) vreg
        # intact, so the axis-0 sum is pure VPU vreg adds into the (8, 128)
        # accumulator (no XLU cross-sublane reduce, no broadcast).
        return jnp.sum(x.reshape(block_rows // _SUBLANES, _SUBLANES, _LANES),
                       axis=0)

    if not needs_mask:
        # Hot path: nothing but vld -> sub -> abs -> add.
        out_ref[...] += fold(abs_diff)
    else:
        block_global = pl.program_id(0) * blocks_per_slice + i
        is_edge = block_global >= num_blocks - 1

        @pl.when(block_global < num_blocks - 1)
        def _():
            # Interior blocks never pay for the mask.
            out_ref[...] += fold(abs_diff)

        @pl.when(is_edge)
        def _():
            # Last real block (array overshoot) and/or clamped duplicate block
            # from the cdiv slice split: zero rows outside the valid range.
            # Keep this a select (NOT mask * abs_diff) so garbage NaN/Inf in
            # the overshoot region cannot propagate.
            row_ids = (block_global * block_rows
                       + lax.broadcasted_iota(jnp.int32, (block_rows, _LANES), 0))
            out_ref[...] += fold(jnp.where(row_ids < valid_rows, abs_diff, 0.0))


def _device_kind():
    try:
        return jax.devices()[0].device_kind.lower()
    except Exception:  # pragma: no cover - best-effort detection only
        return ""


def _default_block_rows():
    kind = _device_kind()
    # 8192 rows = 4 MiB f32 per input per pipeline buffer -> 16 MiB total
    # double-buffered: fits the 32 MiB default scoped VMEM on v6e/v7x.
    # Keep 4096 (8 MiB total) on v5e (16 MiB default limit) and unknown chips.
    if ("v6" in kind) or ("v7" in kind) or ("tpu7" in kind):
        return 8192
    return 4096


def _num_parallel_slices():
    """2 on v7x (2 TensorCores/chip), 1 on earlier generations / unknown."""
    kind = _device_kind()
    return 2 if ("v7" in kind or "tpu7" in kind) else 1


def intensity_loss(image_A, image_B, image_fused, *, block_rows=None):
    """Equivalent of IntensityLoss.forward: F.l1_loss(image_fused, image_B).

    image_A is unused (matches the PyTorch reference semantics).
    """
    del image_A  # unused in the reference forward
    if image_B.shape != image_fused.shape:
        raise ValueError("image_B and image_fused must have the same shape")

    n_elem = image_B.size
    b_flat = image_B.reshape(-1)
    f_flat = image_fused.reshape(-1)

    main_rows = n_elem // _LANES
    main_elems = main_rows * _LANES
    tail_elems = n_elem - main_elems

    # <128-element ragged tail folded in with plain jnp (tiny; avoids an
    # O(N) pad copy of both full inputs for unaligned element counts).
    tail_sum = jnp.float32(0.0)
    if tail_elems:
        tb = lax.slice(b_flat, (main_elems,), (n_elem,)).astype(jnp.float32)
        tf = lax.slice(f_flat, (main_elems,), (n_elem,)).astype(jnp.float32)
        tail_sum = jnp.sum(jnp.abs(tf - tb))

    if main_rows == 0:
        # Degenerate tiny input (< 128 elements): nothing for the kernel to do.
        return (tail_sum / n_elem).astype(jnp.float32)

    if tail_elems:
        b_main = lax.slice(b_flat, (0,), (main_elems,))
        f_main = lax.slice(f_flat, (0,), (main_elems,))
    else:
        b_main, f_main = b_flat, f_flat
    b2d = b_main.reshape(main_rows, _LANES)
    f2d = f_main.reshape(main_rows, _LANES)
    rows = main_rows

    if rows < _SUBLANES:
        # Tiny input: pad to one (8, 128) tile. Both sides padded with zeros,
        # so the extra rows contribute |0 - 0| = 0. O(1 KiB), negligible.
        pad = _SUBLANES - rows
        b2d = jnp.pad(b2d, ((0, pad), (0, 0)))
        f2d = jnp.pad(f2d, ((0, pad), (0, 0)))
        rows = _SUBLANES

    if block_rows is None:
        block_rows = _default_block_rows()
    block_rows = max(_SUBLANES, min(int(block_rows), rows))
    block_rows -= block_rows % _SUBLANES
    num_blocks = pl.cdiv(rows, block_rows)

    num_slices = _num_parallel_slices()
    if num_blocks < num_slices:
        num_slices = 1
    blocks_per_slice = pl.cdiv(num_blocks, num_slices)

    # Mask only needed if the grid overshoots the array (ragged last block
    # and/or a clamped duplicate block from the cdiv slice split).
    needs_mask = (num_slices * blocks_per_slice * block_rows != rows)

    def in_index_map(c, i):
        g = c * blocks_per_slice + i
        return (jnp.minimum(g, num_blocks - 1), 0)

    kernel = functools.partial(
        _l1_sum_kernel,
        block_rows=block_rows,
        blocks_per_slice=blocks_per_slice,
        num_blocks=num_blocks,
        valid_rows=rows,
        needs_mask=needs_mask,
    )

    partials = pl.pallas_call(
        kernel,
        out_shape=jax.ShapeDtypeStruct((_SUBLANES, num_slices * _LANES),
                                       jnp.float32),
        grid_spec=pltpu.PrefetchScalarGridSpec(
            num_scalar_prefetch=0,
            grid=(num_slices, blocks_per_slice),
            in_specs=[
                pl.BlockSpec((block_rows, _LANES), in_index_map),
                pl.BlockSpec((block_rows, _LANES), in_index_map),
            ],
            out_specs=pl.BlockSpec((_SUBLANES, _LANES), lambda c, i: (0, c)),
        ),
        compiler_params=pltpu.CompilerParams(
            dimension_semantics=("parallel", "arbitrary"),
        ),
    )(b2d, f2d)

    total = jnp.sum(partials) + tail_sum
    return (total / n_elem).astype(jnp.float32)


if __name__ == "__main__":
    key = jax.random.PRNGKey(0)

    # Test 1: standard small NCHW images (single block, no mask, no tail).
    kA, kB, kF = jax.random.split(key, 3)
    shape = (2, 4, 16, 16)
    image_A = jax.random.normal(kA, shape, dtype=jnp.float32)
    image_B = jax.random.normal(kB, shape, dtype=jnp.float32)
    image_fused = jax.random.normal(kF, shape, dtype=jnp.float32)

    loss = jax.block_until_ready(intensity_loss(image_A, image_B, image_fused))
    ref = jnp.mean(jnp.abs(image_fused - image_B))
    assert jnp.allclose(loss, ref, rtol=1e-5, atol=1e-6), (loss, ref)

    # Test 2: multi-block + ragged last block (gated mask path) via a small
    # block_rows override.
    kA2, kB2, kF2 = jax.random.split(jax.random.PRNGKey(1), 3)
    shape2 = (1, 1, 40, 128)  # rows=40, block_rows=16 -> 3 blocks, last partial
    image_A2 = jax.random.normal(kA2, shape2, dtype=jnp.float32)
    image_B2 = jax.random.normal(kB2, shape2, dtype=jnp.float32)
    image_F2 = jax.random.normal(kF2, shape2, dtype=jnp.float32)

    loss2 = jax.block_until_ready(
        intensity_loss(image_A2, image_B2, image_F2, block_rows=16))
    ref2 = jnp.mean(jnp.abs(image_F2 - image_B2))
    assert jnp.allclose(loss2, ref2, rtol=1e-5, atol=1e-6), (loss2, ref2)

    # Test 3: element count not a multiple of 128 (jnp tail path, no pad) with
    # bf16 inputs (kernel upcasts internally).
    kA3, kB3, kF3 = jax.random.split(jax.random.PRNGKey(2), 3)
    shape3 = (3, 5, 7, 11)  # 1155 elements: 9 full lane-rows + 3-element tail
    image_A3 = jax.random.normal(kA3, shape3, dtype=jnp.bfloat16)
    image_B3 = jax.random.normal(kB3, shape3, dtype=jnp.bfloat16)
    image_F3 = jax.random.normal(kF3, shape3, dtype=jnp.bfloat16)

    loss3 = jax.block_until_ready(intensity_loss(image_A3, image_B3, image_F3))
    ref3 = jnp.mean(jnp.abs(image_F3.astype(jnp.float32)
                            - image_B3.astype(jnp.float32)))
    assert jnp.allclose(loss3, ref3, rtol=1e-5, atol=1e-6), (loss3, ref3)

    print("KERNEL_OK")
</pallas_src>

<mosaic_0001>
module attributes {stable_mosaic.version = 11 : i64} {
  func.func @_l1_sum_kernel(%arg0: i32, %arg1: i32, %arg2: memref<16x128xf32, #tpu.memory_space<vmem>>, %arg3: memref<16x128xf32, #tpu.memory_space<vmem>>, %arg4: memref<8x128xf32, #tpu.memory_space<vmem>>) attributes {dimension_semantics = [#tpu.dimension_semantics<parallel>, #tpu.dimension_semantics<arbitrary>], iteration_bounds = array<i64: 1, 1>, scalar_prefetch = 0 : i64, scratch_operands = 0 : i64, tpu.core_type = #tpu.core_type<tc>, window_params = [{transform_indices = @transform_0, window_bounds = array<i64: 16, 128>}, {transform_indices = @transform_1, window_bounds = array<i64: 16, 128>}, {transform_indices = @transform_2, window_bounds = array<i64: 8, 128>}]} {
    %c0_i32 = arith.constant 0 : i32
    %0 = arith.cmpi eq, %arg1, %c0_i32 : i32
    %1 = arith.extui %0 : i1 to i32
    %c0_i32_0 = arith.constant 0 : i32
    %2 = arith.cmpi ne, %1, %c0_i32_0 : i32
    scf.if %2 {
      %cst_8 = arith.constant 0.000000e+00 : f32
      %12 = vector.broadcast %cst_8 : f32 to vector<8x128xf32>
      %c0_9 = arith.constant 0 : index
      %c0_10 = arith.constant 0 : index
      %13 = vector.load %arg4[%c0_9, %c0_10] : memref<8x128xf32, #tpu.memory_space<vmem>>, vector<8x128xf32>
      tpu.vector_store %arg4[%c0_9, %c0_10], %12 {strides = array<i32>} : memref<8x128xf32, #tpu.memory_space<vmem>>, vector<8x128xf32>,
    } else {
    }
    %c0 = arith.constant 0 : index
    %c0_1 = arith.constant 0 : index
    %3 = vector.load %arg3[%c0, %c0_1] : memref<16x128xf32, #tpu.memory_space<vmem>>, vector<16x128xf32>
    %c0_2 = arith.constant 0 : index
    %c0_3 = arith.constant 0 : index
    %4 = vector.load %arg2[%c0_2, %c0_3] : memref<16x128xf32, #tpu.memory_space<vmem>>, vector<16x128xf32>
    %5 = arith.subf %3, %4 : vector<16x128xf32>
    %6 = math.absf %5 : vector<16x128xf32>
    %c0_4 = arith.constant 0 : index
    %c0_5 = arith.constant 0 : index
    %7 = vector.load %arg4[%c0_4, %c0_5] : memref<8x128xf32, #tpu.memory_space<vmem>>, vector<8x128xf32>
    %8 = vector.shape_cast %6 : vector<16x128xf32> to vector<2x8x128xf32>
    %cst = arith.constant dense<0.000000e+00> : vector<8x128xf32>
    %9 = vector.multi_reduction <add>, %8, %cst [0] : vector<2x8x128xf32> to vector<8x128xf32>
    %10 = arith.addf %7, %9 : vector<8x128xf32>
    %c0_6 = arith.constant 0 : index
    %c0_7 = arith.constant 0 : index
    %11 = vector.load %arg4[%c0_6, %c0_7] : memref<8x128xf32, #tpu.memory_space<vmem>>, vector<8x128xf32>
    tpu.vector_store %arg4[%c0_6, %c0_7], %10 {strides = array<i32>} : memref<8x128xf32, #tpu.memory_space<vmem>>, vector<8x128xf32>,
    return
  }
  func.func @transform_0(%arg0: i32, %arg1: i32) -> (i32, i32) {
    %c1_i32 = arith.constant 1 : i32
    %0 = arith.muli %arg0, %c1_i32 : i32
    %1 = arith.addi %0, %arg1 : i32
    %c0_i32 = arith.constant 0 : i32
    %2 = arith.minsi %1, %c0_i32 : i32
    %c0_i32_0 = arith.constant 0 : i32
    %c0_i32_1 = arith.constant 0 : i32
    return %2, %c0_i32_0 : i32, i32
  }
  func.func @transform_1(%arg0: i32, %arg1: i32) -> (i32, i32) {
    %c1_i32 = arith.constant 1 : i32
    %0 = arith.muli %arg0, %c1_i32 : i32
    %1 = arith.addi %0, %arg1 : i32
    %c0_i32 = arith.constant 0 : i32
    %2 = arith.minsi %1, %c0_i32 : i32
    %c0_i32_0 = arith.constant 0 : i32
    %c0_i32_1 = arith.constant 0 : i32
    return %2, %c0_i32_0 : i32, i32
  }
  func.func @transform_2(%arg0: i32, %arg1: i32) -> (i32, i32) {
    %c0_i32 = arith.constant 0 : i32
    %c0_i32_0 = arith.constant 0 : i32
    return %c0_i32, %arg0 : i32, i32
  }
}

</mosaic_0001>

<bundles_post_ra>
// kernel: tpu_custom_call.1
= control target key start
LH: loop header
LB: loop body
LE: loop exit
PB: predicated region body
PF: predicated region fallthrough
CT: control target
= control target key end

     0   :  { %7 = vsyncpa [#allocation3], 0  ;;  %s231_s0 = inlined_call_operand.hbm [shape: f32[16,128], index: 0, kind: input, shape index: {}]   ;;  %s232_s1 = inlined_call_operand.hbm [shape: f32[16,128], index: 1, kind: input, shape index: {}]   ;;  %s233_s2 = inlined_call_operand.hbm [shape: f32[8,128], index: 2, kind: output, shape index: {}]  }
   0x1   :  { %8 = vsyncpa [#allocation6], 0 }
   0x2   :  { %9 = vsyncpa [#allocation4], 0  ;;  %s175_s9 = smov [#allocation2]   ;;  %s103_s13 = scalar_lea.hbm %s231_s0, 256 }
   0x3   :  { %s21_s10 = sshll.u32 %s175_s9, 4  ;;  %p104_p0 = scmp.ne.s32.totalorder %s231_s0, %s103_s13  ;;  %s22_s10 = int_to_ptr.vmem [resolvable:$true] %s21_s10 }
   0x4   :  { %p107_p1 = scmp.lt.u32.totalorder %s103_s13, %s231_s0 }
   0x6   :  { %p109_p2 = pnand %p107_p1, %p104_p0 }
   0x8   :  { %112 = shalt.err (!%p109_p2)
}
   0x9   :  { %s113_s18 = scalar_lea.vmem %s22_s10, 256  ;;  %p118_p4 = scmp.lt.s32.totalorder %s22_s10, %s22_s10 }
   0xa   :  { %p114_p3 = scmp.ne.s32.totalorder %s22_s10, %s113_s18  ;;  %p119_p5 = scmp.lt.s32.totalorder %s113_s18, %s113_s18 }
   0xc   :  { %p120_p6 = por %p119_p5, %p118_p4 }
   0xe   :  { %p121_p7 = pnand %p120_p6, %p114_p3 }
  0x10   :  { %124 = shalt.err (!%p121_p7)
}
  0x11   :  { %s176_s19 = smov 128   ;;  %s177_s20 = smov 8  }
  0x12   :  { %27 = dma.hbm_to_vmem [thread:$0]  %s231_s0, 256, %s22_s10, [#allocation3], %s176_s19, %s176_s19, %s177_s20  }
  0x13   :  { %s178_s23 = smov [#allocation5]   ;;  %s125_s27 = scalar_lea.hbm %s232_s1, 256 }
  0x14   :  { %s39_s24 = sshll.u32 %s178_s23, 4  ;;  %p126_p8 = scmp.ne.s32.totalorder %s232_s1, %s125_s27  ;;  %s40_s24 = int_to_ptr.vmem [resolvable:$true] %s39_s24 }
  0x15   :  { %p129_p9 = scmp.lt.u32.totalorder %s125_s27, %s232_s1 }
  0x17   :  { %p131_p10 = pnand %p129_p9, %p126_p8 }
  0x19   :  { %134 = shalt.err (!%p131_p10)
}
  0x1a   :  { %s135_s4 = scalar_lea.vmem %s40_s24, 256  ;;  %p140_p12 = scmp.lt.s32.totalorder %s40_s24, %s40_s24 }
  0x1b   :  { %p136_p11 = scmp.ne.s32.totalorder %s40_s24, %s135_s4  ;;  %p141_p13 = scmp.lt.s32.totalorder %s135_s4, %s135_s4 }
  0x1d   :  { %p142_p0 = por %p141_p13, %p140_p12 }
  0x1f   :  { %p143_p1 = pnand %p142_p0, %p136_p11 }
  0x21   :  { %146 = shalt.err (!%p143_p1)
}
  0x22   :  { %45 = dma.hbm_to_vmem [thread:$0]  %s232_s1, 256, %s40_s24, [#allocation6], %s176_s19, %s176_s19, %s177_s20  }
  0x23   :  { %169 = dma.done.wait [#allocation3], 256  }
  0x24   :  { %170 = vsyncadd [#allocation3], 4294967040 }
  0x25   :  { %171 = dma.done.wait [#allocation6], 256  }
  0x26   :  { %172 = vsyncadd [#allocation6], 4294967040  ;;  %v65_v0 = vld [vmem:[#allocation5] sm:$0xff]  ;;  %v66_v1 = vld [vmem:[#allocation5 + $0x8] sm:$0xff]  ;;  %s179_s6 = smov [#allocation7]  }
  0x27   :  { %v67_v2 = vld [vmem:[#allocation2] sm:$0xff]  ;;  %v68_v3 = vld [vmem:[#allocation2 + $0x8] sm:$0xff]  ;;  %s83_s7 = sshll.u32 %s179_s6, 4  ;;  %s84_s7 = int_to_ptr.vmem [resolvable:$true] %s83_s7 }
  0x28   :  { %v69_v4 = vsub.f32 %v65_v0, %v67_v2  ;;  %v70_v5 = vsub.f32 %v66_v1, %v68_v3  ;;  %s147_s8 = scalar_lea.vmem %s84_s7, 128  ;;  %p152_p3 = scmp.lt.s32.totalorder %s84_s7, %s84_s7 }
  0x29   :  { %p148_p2 = scmp.ne.s32.totalorder %s84_s7, %s147_s8  ;;  %p153_p4 = scmp.lt.s32.totalorder %s147_s8, %s147_s8 }
  0x2a   :  { %v71_v6 = vand.u32 2147483647, %v69_v4  ;;  %v72_v7 = vand.u32 2147483647, %v70_v5 }
  0x2b   :  { %p154_p5 = por %p153_p4, %p152_p3 }
  0x2c   :  { %v74_v8 = vadd.f32 %v72_v7, %v71_v6 }
  0x2d   :  { %p155_p6 = pnand %p154_p5, %p148_p2 }
  0x2e   :  { %76 = vst [vmem:[#allocation7] sm:$0xff] %v74_v8 }
  0x2f   :  { %158 = shalt.err (!%p155_p6)
}
  0x30   :  { %s159_s10 = scalar_lea.hbm %s233_s2, 128 }
  0x31   :  { %p160_p7 = scmp.ne.s32.totalorder %s233_s2, %s159_s10  ;;  %p163_p8 = scmp.lt.u32.totalorder %s159_s10, %s233_s2 }
  0x33   :  { %p165_p9 = pnand %p163_p8, %p160_p7 }
  0x35   :  { %168 = shalt.err (!%p165_p9)
}
  0x36   :  { %86 = dma.vmem_to_hbm [thread:$0]  %s84_s7, 128, %s233_s2, [#allocation4]  }
  0x37   :  { %173 = dma.done.wait [#allocation4], 128  }
  0x38   :  { %174 = vsyncadd [#allocation4], 4294967168 }
  0x39   :  { %90 = vsyncpa [#allocation3], 1 }
  0x3a   :  { %91 = vsyncpa [#allocation6], 1 }
  0x3b   :  { %92 = vsyncpa [#allocation4], 1 }

</bundles_post_ra>
